<compile_context>
chip_gen: v7x
topology: tpu7x:2x2x1
jax: 0.10.0
libtpu: 0.0.40
codegen_flags: <defaults>
</compile_context>

<pallas_src>
import jax
import jax.numpy as jnp
from jax.experimental import pallas as pl
from jax.experimental.pallas import tpu as pltpu


_LANE = 128                      # lane width of a vreg (last-dim tiling unit)
_SUBLANE = 8                     # sublane count (second-minor tiling unit)
_VMEM_SAFE = 14 * 1024 * 1024    # stay below v5e's 16 MiB scoped-VMEM default


# --------------------------------------------------------------------------
# helpers
# --------------------------------------------------------------------------
def _round_up(x: int, m: int) -> int:
    return (x + m - 1) // m * m


def _largest_divisor_leq(n: int, cap: int) -> int:
    """Largest divisor of n that is <= cap (>= 1)."""
    cap = max(1, min(int(cap), n))
    for d in range(cap, 0, -1):
        if n % d == 0:
            return d
    return 1


def _largest_mult8_divisor_leq(n: int, cap_rows: int) -> int:
    """Largest d with 8 | d, d | n, d <= max(cap_rows, 8).  Assumes n % 8 == 0."""
    d = min(n, max(_SUBLANE, (int(cap_rows) // _SUBLANE) * _SUBLANE))
    while d > _SUBLANE:
        if n % d == 0:
            return d
        d -= _SUBLANE
    return _SUBLANE


def _choose_tiles_3d(batch, seq, d_model, ebytes, target, seq_tileable):
    """Pick (bt, st) for output blocks (bt, st, d_model); bt | batch, st | seq."""
    row_bytes = d_model * ebytes
    slab_bytes = seq * row_bytes                 # one batch element of the output
    if slab_bytes <= target or not seq_tileable:
        st = seq
        bt = _largest_divisor_leq(batch, max(1, target // max(slab_bytes, 1)))
    else:
        st = _largest_mult8_divisor_leq(seq, max(1, target // row_bytes))
        bt = 1
    # v7x has 2 TensorCores: guarantee >= 2 grid steps whenever the shape allows.
    if st == seq and bt == batch:
        if batch > 1:
            bt = _largest_divisor_leq(batch, max(1, batch // 2))
        elif seq_tileable and seq >= 2 * _SUBLANE:
            st = _largest_mult8_divisor_leq(seq, seq // 2)
    return bt, st


def _choose_tiles_flat(batch, flat, ebytes, target):
    """Pick (bt, ft) for output blocks (bt, ft) of the flattened layout."""
    bt = batch                                   # full-batch block: no %8 constraint
    bt_pad = _round_up(bt, _SUBLANE)
    m = flat // _LANE                            # flat % 128 == 0 by construction
    # Budget the sublane-padded (8, ft) input block alongside the (bt, ft) output.
    want_cols = max(_LANE, target // ((bt_pad + _SUBLANE) * ebytes))
    ft = _LANE * _largest_divisor_leq(m, max(1, want_cols // _LANE))
    # v7x has 2 TensorCores: guarantee >= 2 grid steps whenever the shape allows.
    if ft == flat and m >= 2:
        ft = _LANE * _largest_divisor_leq(m, max(1, m // 2))
    return bt, ft


def _compiler_params(semantics, footprint_bytes):
    kwargs = dict(dimension_semantics=semantics)
    if footprint_bytes > _VMEM_SAFE:
        kwargs["vmem_limit_bytes"] = int(min(footprint_bytes + (2 << 20), 96 << 20))
    return pltpu.CompilerParams(**kwargs)


# --------------------------------------------------------------------------
# kernels: pure copy streams (1 vld + 1 vst per output vreg, no MXU/XLU/EUP)
# --------------------------------------------------------------------------
def _pos_embed_kernel_3d(w_ref, out_ref):
    # w_ref  : (st, d_model) tile of W_pos rows
    # out_ref: (bt, st, d_model) tile of the output
    bt = out_ref.shape[0]
    if bt <= 32:
        for b in range(bt):                      # explicit per-row copy stream
            out_ref[b] = w_ref[...]
    else:
        out_ref[...] = jnp.broadcast_to(w_ref[...], out_ref.shape)


def _pos_embed_kernel_flat(w_ref, out_ref):
    # w_ref  : (1, ft) lane-dense chunk of the flattened W_pos[:seq] row
    # out_ref: (bt, ft) tile of the flattened output
    bt = out_ref.shape[0]
    if bt <= 32:
        for b in range(bt):                      # explicit per-row copy stream
            out_ref[pl.ds(b, 1)] = w_ref[...]
    else:
        out_ref[...] = jnp.broadcast_to(w_ref[...], out_ref.shape)


# --------------------------------------------------------------------------
# wrapper
# --------------------------------------------------------------------------
def pos_embed(tokens: jax.Array, w_pos: jax.Array,
              *, target_block_bytes: int = 4 * 1024 * 1024) -> jax.Array:
    """tokens: (batch, seq) int array (values unused); w_pos: (n_ctx, d_model).

    Returns (batch, seq, d_model) = broadcast of w_pos[:seq] over batch.
    """
    batch, seq = tokens.shape
    n_ctx, d_model = w_pos.shape
    assert 0 < seq <= n_ctx, "seq must be in (0, n_ctx]"

    ebytes = jnp.dtype(w_pos.dtype).itemsize
    flat = seq * d_model
    cost = pl.CostEstimate(flops=0, transcendentals=0,
                           bytes_accessed=(batch + 1) * flat * ebytes)

    # Lane-dense flatten only when d_model itself is not a 128-multiple but the
    # flattened row is; otherwise tile (seq, d_model) directly (no host copy).
    use_flat = (d_model % _LANE != 0) and (flat % _LANE == 0)

    if not use_flat:
        # ---------------- 3-D fast path (and fallback for flat % 128 != 0) ----
        seq_tileable = (seq % _SUBLANE == 0)
        bt, st = _choose_tiles_3d(batch, seq, d_model, ebytes,
                                  target_block_bytes, seq_tileable)
        # Pass W_pos unsliced when seq rows can be tiled in 8-row multiples;
        # the index_map only ever touches the first `seq` rows.
        w_in = w_pos if seq_tileable else w_pos[:seq]

        st_pad = _round_up(st, _SUBLANE)
        d_pad = _round_up(d_model, _LANE)
        footprint = 2 * (st_pad * d_pad + bt * st_pad * d_pad) * ebytes

        grid = (seq // st, batch // bt)          # seq tiles outer -> W block reused
        return pl.pallas_call(
            _pos_embed_kernel_3d,
            out_shape=jax.ShapeDtypeStruct((batch, seq, d_model), w_pos.dtype),
            grid=grid,
            in_specs=[pl.BlockSpec((st, d_model), lambda l, b: (l, 0))],
            out_specs=pl.BlockSpec((bt, st, d_model), lambda l, b: (b, l, 0)),
            compiler_params=_compiler_params(("parallel", "parallel"), footprint),
            cost_estimate=cost,
        )(w_in)

    # ---------------- flattened lane-dense path (d_model % 128 != 0) ----------
    bt, ft = _choose_tiles_flat(batch, flat, ebytes, target_block_bytes)
    w_row = w_pos[:seq].reshape(1, flat)         # contiguous -> cheap host reshape

    footprint = 2 * (_SUBLANE * ft + _round_up(bt, _SUBLANE) * ft) * ebytes

    grid = (flat // ft,)
    out2d = pl.pallas_call(
        _pos_embed_kernel_flat,
        out_shape=jax.ShapeDtypeStruct((batch, flat), w_pos.dtype),
        grid=grid,
        in_specs=[pl.BlockSpec((1, ft), lambda l: (0, l))],
        out_specs=pl.BlockSpec((bt, ft), lambda l: (0, l)),
        compiler_params=_compiler_params(("parallel",), footprint),
        cost_estimate=cost,
    )(w_row)
    return out2d.reshape(batch, seq, d_model)


# --------------------------------------------------------------------------
# self-test
# --------------------------------------------------------------------------
if __name__ == "__main__":
    init_range = 0.02
    key = jax.random.PRNGKey(0)
    k_pos, k_tok, k_pos2, k_tok2 = jax.random.split(key, 4)

    # --- small toy config (exercises the flattened lane-dense path) ---------
    batch, seq = 2, 8
    n_ctx, d_model = 64, 32
    W_pos = init_range * jax.random.normal(k_pos, (n_ctx, d_model), dtype=jnp.float32)
    tokens = jax.random.randint(k_tok, (batch, seq), 0, 50257, dtype=jnp.int32)

    out = jax.block_until_ready(pos_embed(tokens, W_pos))
    ref = jnp.broadcast_to(W_pos[:seq][None, :, :], (batch, seq, d_model))
    assert out.shape == (batch, seq, d_model)
    assert out.dtype == jnp.float32
    assert jnp.allclose(out, ref)

    # --- GPT-2-like d_model (exercises the 3-D fast path, small shapes) -----
    batch2, seq2 = 4, 128
    n_ctx2, d_model2 = 256, 768
    W_pos2 = init_range * jax.random.normal(k_pos2, (n_ctx2, d_model2), dtype=jnp.float32)
    tokens2 = jax.random.randint(k_tok2, (batch2, seq2), 0, 50257, dtype=jnp.int32)

    out2 = jax.block_until_ready(pos_embed(tokens2, W_pos2))
    ref2 = jnp.broadcast_to(W_pos2[:seq2][None, :, :], (batch2, seq2, d_model2))
    assert out2.shape == (batch2, seq2, d_model2)
    assert jnp.allclose(out2, ref2)

    print("KERNEL_OK")
</pallas_src>

<mosaic_0001>
module attributes {stable_mosaic.version = 11 : i64} {
  func.func @_pos_embed_kernel_flat(%arg0: i32, %arg1: memref<1x128xf32, #tpu.memory_space<vmem>>, %arg2: memref<2x128xf32, #tpu.memory_space<vmem>>) attributes {dimension_semantics = [#tpu.dimension_semantics<parallel>], iteration_bounds = array<i64: 2>, scalar_prefetch = 0 : i64, scratch_operands = 0 : i64, tpu.core_type = #tpu.core_type<tc>, window_params = [{transform_indices = @transform_0, window_bounds = array<i64: 1, 128>}, {transform_indices = @transform_1, window_bounds = array<i64: 2, 128>}]} {
    %c0 = arith.constant 0 : index
    %c0_0 = arith.constant 0 : index
    %0 = vector.load %arg1[%c0, %c0_0] : memref<1x128xf32, #tpu.memory_space<vmem>>, vector<1x128xf32>
    %c0_1 = arith.constant 0 : index
    %c0_2 = arith.constant 0 : index
    %1 = vector.load %arg2[%c0_1, %c0_2] : memref<2x128xf32, #tpu.memory_space<vmem>>, vector<1x128xf32>
    tpu.vector_store %arg2[%c0_1, %c0_2], %0 {strides = array<i32>} : memref<2x128xf32, #tpu.memory_space<vmem>>, vector<1x128xf32>,
    %c0_3 = arith.constant 0 : index
    %c0_4 = arith.constant 0 : index
    %2 = vector.load %arg1[%c0_3, %c0_4] : memref<1x128xf32, #tpu.memory_space<vmem>>, vector<1x128xf32>
    %c1 = arith.constant 1 : index
    %c0_5 = arith.constant 0 : index
    %3 = vector.load %arg2[%c1, %c0_5] : memref<2x128xf32, #tpu.memory_space<vmem>>, vector<1x128xf32>
    tpu.vector_store %arg2[%c1, %c0_5], %2 {strides = array<i32>} : memref<2x128xf32, #tpu.memory_space<vmem>>, vector<1x128xf32>,
    return
  }
  func.func @transform_0(%arg0: i32) -> (i32, i32) {
    %c0_i32 = arith.constant 0 : i32
    %c0_i32_0 = arith.constant 0 : i32
    return %c0_i32, %arg0 : i32, i32
  }
  func.func @transform_1(%arg0: i32) -> (i32, i32) {
    %c0_i32 = arith.constant 0 : i32
    %c0_i32_0 = arith.constant 0 : i32
    return %c0_i32, %arg0 : i32, i32
  }
}

</mosaic_0001>

<bundles_post_ra>
// kernel: tpu_custom_call.1
= control target key start
LH: loop header
LB: loop body
LE: loop exit
PB: predicated region body
PF: predicated region fallthrough
CT: control target
= control target key end

     0   :  { %6 = vsyncpa [#allocation3], 0  ;;  %s542_s0 = inlined_call_operand.hbm [shape: f32[1,256], index: 0, kind: input, shape index: {}]   ;;  %s543_s1 = inlined_call_operand.hbm [shape: f32[2,256], index: 1, kind: output, shape index: {}]  }
   0x1   :  { %8 = vsyncpa [#allocation3 + $0x1], 0 }
   0x2   :  { %9 = vsyncpa [#allocation4], 0 }
   0x3   :  { %11 = vsyncpa [#allocation4 + $0x1], 0  ;;  %s380_s6 = smov 0   ;;  %s382_s7 = smov 0  }
   0x4   :  { %s384_s8 = smov 0   ;;  %s386_s9 = smov 0  }
   0x5 LB: > { %s401_s10 = sadd.s32 4294967295, %s366_s9   ;;  %s214_s11 = sadd.s32 4294967294, %s366_s9   ;;  %s366_s9 = sphi %s386_s9, %s558_s9   ;;  %s362_s8 = sphi %s384_s8, %s557_s8   ;;  %s358_s7 = sphi %s382_s7, %s556_s7   ;;  %s354_s6 = sphi %s380_s6, %s555_s6  }
   0x6   : > { %s405_s12 = sadd.s32 1, %s366_s9   ;;  %s24_s13 = sadd.s32 1, %s362_s8 }
   0x7   : > { %s21_s14 = ssub.s32 %s366_s9, %s405_s12  ;;  %p31_p0 = scmp.ne.s32.totalorder %s362_s8, %s358_s7 }
   0x8   : > { %p22_p1 = scmp.eq.s32.totalorder %s21_s14, 0  ;;  %p32_p2 = scmp.eq.s32.totalorder %s366_s9, 0 }
   0x9   : > { %p37_p3 = scmp.ne.s32.totalorder %s358_s7, %s354_s6  ;;  %p38_p4 = scmp.eq.s32.totalorder %s401_s10, 0 }
   0xa   : > { %s417_s15 = scalar_select %p22_p1, %s362_s8, %s24_s13  }
   0xb   : > { %p419_p5 = por %p32_p2, %p31_p0  ;;  %p423_p6 = por %p38_p4, %p37_p3 }
   0xc   : > { %p61_p7 = scmp.eq.s32.totalorder %s401_s10, 1  ;;  %p67_p8 = scmp.eq.s32.totalorder %s214_s11, 1 }
   0xd   : > { %p236_p10 = scmp.lt.s32.totalorder %s366_s9, 2  ;;  %s87_s20 = sand.u32 1, %s362_s8  }
   0xe   : > { %p430_p11 = por %p61_p7, %p31_p0  ;;  %p434_p12 = por %p67_p8, %p37_p3 }
   0xf   : > { %s217_s21 = sshll.u32 %s366_s9, 4  ;;  %s90_s25 = scalar_lea.vmem [#allocation2], %s87_s20 }
  0x10   : > { %s547_s18 = scalar_select %p430_p11, 1, 0 }
  0x11   : > { %s548_s19 = scalar_select %p434_p12, 1, 0 }
  0x12   : > { %s443_s24 = scalar_lea.hbm %s542_s0, %s217_s21  ;;  %s97_s26 = sshll.u32 %s90_s25, 4  ;;  %s445_s26 = int_to_ptr.vmem [resolvable:$true] %s97_s26 }
  0x13   : > { %p449_p13 = pnand %p236_p10, %p419_p5  ;;  %s88_s28 = scalar_lea.sflag [#allocation3], %s87_s20 }
  0x14   : > { %s270_s29 = scalar_lea.hbm %s443_s24, 16  ;;  %s275_s3 = scalar_lea.hbm %s542_s0, 32 }
  0x15   : > { %p271_p2 = scmp.ne.s32.totalorder %s443_s24, %s270_s29  ;;  %p272_p3 = pneg %p449_p13 }
  0x16   : > { %p276_p5 = scmp.lt.u32.totalorder %s443_s24, %s542_s0  ;;  %p277_p8 = scmp.lt.u32.totalorder %s275_s3, %s270_s29 }
  0x17   : > { %p273_p4 = pnand %p272_p3, %p271_p2  ;;  %p279_p9 = scmp.lt.u32.totalorder %s270_s29, %s443_s24 }
  0x18   : > { %p278_p10 = por %p277_p8, %p276_p5 }
  0x19   : > { %p274_p7 = pneg %p273_p4 }
  0x1a   : > { %p280_p0 = por %p279_p9, %p278_p10 }
  0x1c   : > { %p281_p1 = pnand %p280_p0, %p274_p7 }
  0x1e   : > { %284 = shalt.err (!%p281_p1)
}
  0x1f   : > { %s285_s11 = scalar_lea.vmem %s445_s26, 16  ;;  %s368_s13 = smov [#allocation2]  }
  0x20   : > { %p286_p2 = scmp.ne.s32.totalorder %s445_s26, %s285_s11  ;;  %s290_s14 = sshll.u32 %s368_s13, 4  ;;  %s291_s14 = int_to_ptr.vmem [resolvable:$false] %s290_s14 }
  0x21   : > { %s292_s16 = scalar_lea.vmem %s291_s14, 32  ;;  %p293_p11 = scmp.lt.s32.totalorder %s445_s26, %s291_s14 }
  0x22   : > { %p288_p4 = pnand %p286_p2, %p272_p3  ;;  %p294_p5 = scmp.lt.s32.totalorder %s292_s16, %s285_s11 }
  0x24   : > { %p289_p12 = pneg %p288_p4  ;;  %p295_p8 = por %p294_p5, %p293_p11 }
  0x26   : > { %p296_p9 = pnand %p295_p8, %p289_p12 }
  0x28   : > { %299 = shalt.err (!%p296_p9)
}
  0x29   : > { %231 = dma.hbm_to_vmem [thread:$0]  (!%p449_p13), %s443_s24, 16, %s445_s26, %s88_s28  }
  0x2a   : > { %p550_p0 = scmp.lt.s32.totalorder %s366_s9, 3  ;;  %p551_p1 = scmp.ge.s32.totalorder %s366_s9, 1 }
  0x2c   : > { %p103_p3 = pnand %p551_p1, %p550_p0 }
  0x2d   : > { %s485_s20 = sand.u32 (!%p103_p3), 1, %s358_s7  }
  0x2e   : > { %106 = sbr.rel (%p103_p3) target bundleno = 80 (0x50), region = 24  ;;  %s109_s21 = scalar_lea.sflag (!%p103_p3), [#allocation3], %s485_s20 }
  0x2f   : > { %s111_s22 = scalar_lea.vmem (!%p103_p3), [#allocation2], %s485_s20 }
  0x35   : > { %345 = dma.done.wait (%p423_p6), %s109_s21, 16  }
  0x36   : > { %347 = vsyncadd (%p423_p6), %s109_s21, 4294967280  ;;  %s219_s23 = sshll.u32 %s485_s20, 1  ;;  %s221_s26 = sshll.u32 %s401_s10, 5  ;;  %v129_v0 = vld [vmem:[%s111_s22] sm:$0x1] }
  0x37   : > { %s128_s24 = scalar_lea.vmem [#allocation5], %s219_s23  ;;  %s500_s29 = scalar_lea.hbm %s543_s1, %s221_s26  ;;  %v131_v1 = vld [vmem:[%s111_s22] sm:$0x1] }
  0x38   : > { %s147_s25 = sshll.u32 %s128_s24, 4  ;;  %130 = vst [vmem:[%s128_s24] sm:$0x1] %v129_v0  ;;  %132 = vst [vmem:[%s128_s24 + $0x1] sm:$0x1] %v131_v1  ;;  %s134_s17 = scalar_lea.sflag [#allocation4], %s485_s20  ;;  %s495_s25 = int_to_ptr.vmem [resolvable:$true] %s147_s25 }
  0x39   : > { %s300_s30 = scalar_lea.vmem %s495_s25, 32  ;;  %p552_p11 = scmp.ne.s32.totalorder %s547_s18, 0 }
  0x3a   : > { %p301_p6 = scmp.ne.s32.totalorder %s495_s25, %s300_s30  ;;  %s369_s10 = smov [#allocation5]  }
  0x3b   : > { %s304_s2 = sshll.u32 %s369_s10, 4  ;;  %s305_s2 = int_to_ptr.vmem [resolvable:$false] %s304_s2 }
  0x3c   : > { %p302_p12 = pnand %p301_p6, %p552_p11  ;;  %s306_s3 = scalar_lea.vmem %s305_s2, 64 }
  0x3d   : > { %p307_p7 = scmp.lt.s32.totalorder %s495_s25, %s305_s2  ;;  %p308_p10 = scmp.lt.s32.totalorder %s306_s3, %s300_s30 }
  0x3e   : > { %p303_p13 = pneg %p302_p12 }
  0x3f   : > { %p309_p2 = por %p308_p10, %p307_p7 }
  0x41   : > { %p310_p4 = pnand %p309_p2, %p303_p13 }
  0x43   : > { %313 = shalt.err (!%p310_p4)
}
  0x44   : > { %s314_s4 = scalar_lea.hbm %s500_s29, 32  ;;  %s318_s13 = scalar_lea.hbm %s543_s1, 64 }
  0x45   : > { %p315_p5 = scmp.ne.s32.totalorder %s500_s29, %s314_s4  ;;  %p319_p0 = scmp.lt.u32.totalorder %s500_s29, %s543_s1 }
  0x46   : > { %p320_p1 = scmp.lt.u32.totalorder %s318_s13, %s314_s4  ;;  %p322_p6 = scmp.lt.u32.totalorder %s314_s4, %s500_s29 }
  0x47   : > { %p316_p8 = pnand %p315_p5, %p552_p11 }
  0x48   : > { %p321_p3 = por %p320_p1, %p319_p0 }
  0x49   : > { %p317_p9 = pneg %p316_p8 }
  0x4a   : > { %p323_p12 = por %p322_p6, %p321_p3 }
  0x4c   : > { %p324_p13 = pnand %p323_p12, %p317_p9 }
  0x4e   : > { %327 = shalt.err (!%p324_p13)
}
  0x4f   : > { %226 = dma.vmem_to_hbm [thread:$0]  (%p552_p11), %s495_s25, 32, %s500_s29, %s134_s17  }
  0x50 PF: > { %s159_s20 = sand.u32 1, %s354_s6   ;;  %p553_p7 = scmp.ne.s32.totalorder %s548_s19, 0 }
  0x51   : > { %p554_p10 = scmp.ge.s32.totalorder %s366_s9, 2  ;;  %s160_s21 = scalar_lea.sflag [#allocation4], %s159_s20 }
  0x53   : > { %p233_p2 = pnand %p554_p10, %p553_p7 }
  0x55   : > { %349 = dma.done.wait (!%p233_p2), %s160_s21, 32  }
  0x56   : > { %351 = vsyncadd (!%p233_p2), %s160_s21, 4294967264  ;;  %p14_p4 = scmp.ge.s32.totalorder %s405_s12, 4   ;;  %s555_s6 = smov %s358_s7 }
  0x57   : > { %s556_s7 = smov %s362_s8  ;;  %s557_s8 = smov %s417_s15 }
  0x58   : > { %s558_s9 = smov %s405_s12  ;;  %16 = sbr.rel (!%p14_p4) target bundleno = 5 (0x5), region = 69 }
  0x5f   :  { %165 = vsyncpa [#allocation3], 1 }
  0x60   :  { %167 = vsyncpa [#allocation3 + $0x1], 1 }
  0x61   :  { %168 = vsyncpa [#allocation4], 1 }
  0x62   :  { %170 = vsyncpa [#allocation4 + $0x1], 1 }

</bundles_post_ra>
